<compile_context>
chip_gen: v7x
topology: tpu7x:2x2x1
jax: 0.10.0
libtpu: 0.0.40
codegen_flags: <defaults>
</compile_context>

<pallas_src>
import functools

import jax
import jax.numpy as jnp
from jax.experimental import pallas as pl
from jax.experimental.pallas import tpu as pltpu


def _evonorm_s0_kernel(x_ref, p_ref, o_ref, *, eps, n_elems):
    # x_ref: (Bn, Bg, Cg, HW)  input block, native dtype
    # p_ref: (3,  Bg, Cg, 1)   stacked [v, gamma, beta], native dtype
    # o_ref: (Bn, Bg, Cg, HW)
    x = x_ref[...]
    v = p_ref[0][None]        # (1, Bg, Cg, 1): broadcasts over Bn and HW lanes
    gamma = p_ref[1][None]
    beta = p_ref[2][None]

    # Per-(batch, group) statistics, single pass, accumulated in f32.
    xf = x.astype(jnp.float32)
    s = jnp.sum(jnp.sum(xf, axis=3, keepdims=True), axis=2, keepdims=True)
    ss = jnp.sum(jnp.sum(xf * xf, axis=3, keepdims=True), axis=2, keepdims=True)
    inv_n = 1.0 / n_elems
    inv_nm1 = 1.0 / max(n_elems - 1.0, 1.0)        # torch.var default: unbiased
    var = jnp.maximum((ss - s * s * inv_n) * inv_nm1, 0.0)
    inv_std = jax.lax.rsqrt(var + eps)             # f32, (Bn, Bg, 1, 1)

    # Elementwise path in the input dtype (bf16-native VPU/EUP on v6e/v7x;
    # v5e upcasts in hardware).  sigmoid(z) == 0.5*tanh(0.5*z)+0.5 keeps it
    # to a single EUP transcendental per element.
    z = v * x
    num = x * (0.5 * jnp.tanh(0.5 * z) + 0.5)
    scale = gamma * inv_std.astype(x.dtype)        # (Bn, Bg, Cg, 1)
    o_ref[...] = (num * scale + beta).astype(o_ref.dtype)


def _padded_slab_bytes(cg, hw, dtype):
    """VMEM bytes of one (n, g) slab after (sublane, lane) tile padding."""
    itemsize = jnp.dtype(dtype).itemsize
    sublane = 8 * max(1, 4 // itemsize)            # 8 f32 / 16 bf16 / 32 int8
    lane = 128
    return (-(-cg // sublane) * sublane) * (-(-hw // lane) * lane) * itemsize


def _largest_divisor_leq(n, cap):
    for d in range(min(n, cap), 0, -1):
        if n % d == 0:
            return d
    return 1


def _pick_blocks(n_batch, n_groups, slab_bytes, target_bytes):
    """Choose (Bn, Bg) so the x block is ~target_bytes of padded VMEM."""
    max_slabs = max(1, int(target_bytes // max(1, slab_bytes)))
    bg = _largest_divisor_leq(n_groups, max_slabs)
    bn = _largest_divisor_leq(n_batch, max(1, max_slabs // bg))
    return bn, bg


def evonorm2d_s0(x, v, gamma, beta, *, groups=32, eps=1e-5):
    """EvoNorm2D forward (S0, non_linear=True, efficient=False, affine=True)."""
    N, C, H, W = x.shape
    assert C % groups == 0, "channels must be divisible by groups"
    G = groups
    Cg = C // G
    HW = H * W

    # 4-D view: lane axis = HW, sublane axis = Cg.  Per-channel params then
    # broadcast along lanes for free -> no H*W pre-expansion, no extra HBM.
    # TODO(synk): when HW is far from a multiple of 128 (e.g. 7x7 maps) the
    # trailing lanes are masked; a (G, Cg*HW) layout with in-kernel param
    # expansion would be denser at the cost of an in-kernel relayout.
    x_r = x.reshape(N, G, Cg, HW)
    params = (jnp.stack([v, gamma, beta], axis=0)
              .reshape(3, G, Cg, 1)
              .astype(x.dtype))                    # channel c == (g*Cg + cg)

    # Generation-aware VMEM budget and block sizing.
    try:
        vmem_cap = int(pltpu.get_tpu_info().vmem_capacity_bytes)
    except Exception:
        vmem_cap = 128 * 2**20
    vmem_limit = int(min(0.75 * vmem_cap, 96 * 2**20))   # ~48 MiB on v7x
    target_block = int(min(8 * 2**20, max(4 * 2**20, vmem_limit // 16)))

    slab_bytes = _padded_slab_bytes(Cg, HW, x.dtype)
    Bn, Bg = _pick_blocks(N, G, slab_bytes, target_block)
    # TODO(synk): if a single (n, g) slab alone exceeds the VMEM budget, a
    # two-pass HW-tiled (sum/sumsq then normalize) scheme is required.

    # Batch axis innermost -> param block index is invariant along it, so its
    # DMA is skipped on every inner step.  Keep a >=2-extent "parallel" axis
    # for v7x megacore sharding.
    grid = (G // Bg, N // Bn)
    if grid[0] > 1:
        dims = ("parallel", "arbitrary")
    else:
        dims = ("arbitrary", "parallel")

    kernel = functools.partial(
        _evonorm_s0_kernel, eps=float(eps), n_elems=float(Cg * HW))

    x_spec = pl.BlockSpec((Bn, Bg, Cg, HW), lambda g, n: (n, g, 0, 0))
    p_spec = pl.BlockSpec((3, Bg, Cg, 1), lambda g, n: (0, g, 0, 0))

    out_r = pl.pallas_call(
        kernel,
        out_shape=jax.ShapeDtypeStruct((N, G, Cg, HW), x.dtype),
        grid=grid,
        in_specs=[x_spec, p_spec],
        out_specs=x_spec,
        compiler_params=pltpu.CompilerParams(
            dimension_semantics=dims,
            vmem_limit_bytes=vmem_limit,
        ),
    )(x_r, params)

    return out_r.reshape(N, C, H, W)


# TODO(synk): version='B0' path (running_var in-place buffer update,
# instance_std with max()) and efficient=True swish variant not implemented;
# the module defaults exercise only the S0 / non-efficient forward.


def _reference_evonorm_s0(x, v, gamma, beta, *, groups, eps):
    """Pure-JAX reference matching the PyTorch forward (S0, non-efficient)."""
    N, C, H, W = x.shape
    Cg = C // groups
    xg = x.reshape(N, groups, Cg, H, W)
    mean = jnp.mean(xg, axis=(2, 3, 4), keepdims=True)
    n = Cg * H * W
    var = jnp.sum((xg - mean) ** 2, axis=(2, 3, 4), keepdims=True) / (n - 1)
    std = jnp.sqrt(var + eps)
    std = jnp.broadcast_to(std, xg.shape).reshape(N, C, H, W)
    num = x * jax.nn.sigmoid(v * x)
    return num / std * gamma + beta


if __name__ == "__main__":
    N, C, H, W = 2, 8, 16, 16
    groups = 4
    eps = 1e-5

    key = jax.random.PRNGKey(0)
    kx, kv, kg, kb = jax.random.split(key, 4)

    x = jax.random.normal(kx, (N, C, H, W), dtype=jnp.float32)
    # Module __init__ sets v/gamma=ones, beta=zeros; use deterministic random
    # values of the same shapes to exercise per-channel broadcasting.
    v = 1.0 + 0.1 * jax.random.normal(kv, (1, C, 1, 1), dtype=jnp.float32)
    gamma = 1.0 + 0.1 * jax.random.normal(kg, (1, C, 1, 1), dtype=jnp.float32)
    beta = 0.1 * jax.random.normal(kb, (1, C, 1, 1), dtype=jnp.float32)

    out = evonorm2d_s0(x, v, gamma, beta, groups=groups, eps=eps)
    out = jax.block_until_ready(out)

    ref = _reference_evonorm_s0(x, v, gamma, beta, groups=groups, eps=eps)
    assert out.shape == (N, C, H, W)
    assert jnp.allclose(out, ref, atol=1e-4, rtol=1e-4), "mismatch vs reference"

    print("KERNEL_OK")
</pallas_src>

<mosaic_0001>
module attributes {stable_mosaic.version = 11 : i64} {
  func.func @_evonorm_s0_kernel(%arg0: i32, %arg1: i32, %arg2: memref<2x4x2x256xf32, #tpu.memory_space<vmem>>, %arg3: memref<3x4x2x1xf32, #tpu.memory_space<vmem>>, %arg4: memref<2x4x2x256xf32, #tpu.memory_space<vmem>>) attributes {dimension_semantics = [#tpu.dimension_semantics<arbitrary>, #tpu.dimension_semantics<parallel>], iteration_bounds = array<i64: 1, 1>, scalar_prefetch = 0 : i64, scratch_operands = 0 : i64, tpu.core_type = #tpu.core_type<tc>, window_params = [{transform_indices = @transform_0, window_bounds = array<i64: 2, 4, 2, 256>}, {transform_indices = @transform_1, window_bounds = array<i64: 3, 4, 2, 1>}, {transform_indices = @transform_2, window_bounds = array<i64: 2, 4, 2, 256>}]} {
    %c0 = arith.constant 0 : index
    %c0_0 = arith.constant 0 : index
    %c0_1 = arith.constant 0 : index
    %c0_2 = arith.constant 0 : index
    %0 = vector.load %arg2[%c0, %c0_0, %c0_1, %c0_2] : memref<2x4x2x256xf32, #tpu.memory_space<vmem>>, vector<2x4x2x256xf32>
    %c0_3 = arith.constant 0 : index
    %c0_4 = arith.constant 0 : index
    %c0_5 = arith.constant 0 : index
    %c0_6 = arith.constant 0 : index
    %1 = vector.load %arg3[%c0_3, %c0_4, %c0_5, %c0_6] : memref<3x4x2x1xf32, #tpu.memory_space<vmem>>, vector<1x4x2x1xf32>
    %2 = vector.shape_cast %1 : vector<1x4x2x1xf32> to vector<4x2x1xf32>
    %3 = vector.shape_cast %2 : vector<4x2x1xf32> to vector<1x4x2x1xf32>
    %c1 = arith.constant 1 : index
    %c0_7 = arith.constant 0 : index
    %c0_8 = arith.constant 0 : index
    %c0_9 = arith.constant 0 : index
    %4 = vector.load %arg3[%c1, %c0_7, %c0_8, %c0_9] : memref<3x4x2x1xf32, #tpu.memory_space<vmem>>, vector<1x4x2x1xf32>
    %5 = vector.shape_cast %4 : vector<1x4x2x1xf32> to vector<4x2x1xf32>
    %6 = vector.shape_cast %5 : vector<4x2x1xf32> to vector<1x4x2x1xf32>
    %c2 = arith.constant 2 : index
    %c0_10 = arith.constant 0 : index
    %c0_11 = arith.constant 0 : index
    %c0_12 = arith.constant 0 : index
    %7 = vector.load %arg3[%c2, %c0_10, %c0_11, %c0_12] : memref<3x4x2x1xf32, #tpu.memory_space<vmem>>, vector<1x4x2x1xf32>
    %8 = vector.shape_cast %7 : vector<1x4x2x1xf32> to vector<4x2x1xf32>
    %9 = vector.shape_cast %8 : vector<4x2x1xf32> to vector<1x4x2x1xf32>
    %cst = arith.constant dense<0.000000e+00> : vector<2x4x2xf32>
    %10 = vector.multi_reduction <add>, %0, %cst [3] : vector<2x4x2x256xf32> to vector<2x4x2xf32>
    %11 = vector.shape_cast %10 : vector<2x4x2xf32> to vector<2x4x2x1xf32>
    %cst_13 = arith.constant dense<0.000000e+00> : vector<2x4x1xf32>
    %12 = vector.multi_reduction <add>, %11, %cst_13 [2] : vector<2x4x2x1xf32> to vector<2x4x1xf32>
    %13 = vector.shape_cast %12 : vector<2x4x1xf32> to vector<2x4x1x1xf32>
    %14 = arith.mulf %0, %0 : vector<2x4x2x256xf32>
    %cst_14 = arith.constant dense<0.000000e+00> : vector<2x4x2xf32>
    %15 = vector.multi_reduction <add>, %14, %cst_14 [3] : vector<2x4x2x256xf32> to vector<2x4x2xf32>
    %16 = vector.shape_cast %15 : vector<2x4x2xf32> to vector<2x4x2x1xf32>
    %cst_15 = arith.constant dense<0.000000e+00> : vector<2x4x1xf32>
    %17 = vector.multi_reduction <add>, %16, %cst_15 [2] : vector<2x4x2x1xf32> to vector<2x4x1xf32>
    %18 = vector.shape_cast %17 : vector<2x4x1xf32> to vector<2x4x1x1xf32>
    %19 = arith.mulf %13, %13 : vector<2x4x1x1xf32>
    %cst_16 = arith.constant 0.001953125 : f32
    %20 = vector.broadcast %cst_16 : f32 to vector<2x4x1x1xf32>
    %21 = arith.mulf %19, %20 : vector<2x4x1x1xf32>
    %22 = arith.subf %18, %21 : vector<2x4x1x1xf32>
    %cst_17 = arith.constant 0.00195694715 : f32
    %23 = vector.broadcast %cst_17 : f32 to vector<2x4x1x1xf32>
    %24 = arith.mulf %22, %23 : vector<2x4x1x1xf32>
    %cst_18 = arith.constant 0.000000e+00 : f32
    %25 = vector.broadcast %cst_18 : f32 to vector<2x4x1x1xf32>
    %26 = arith.maximumf %24, %25 : vector<2x4x1x1xf32>
    %cst_19 = arith.constant 9.99999974E-6 : f32
    %27 = vector.broadcast %cst_19 : f32 to vector<2x4x1x1xf32>
    %28 = arith.addf %26, %27 : vector<2x4x1x1xf32>
    %29 = math.rsqrt %28 : vector<2x4x1x1xf32>
    %30 = vector.broadcast %3 : vector<1x4x2x1xf32> to vector<2x4x2x256xf32>
    %31 = arith.mulf %30, %0 : vector<2x4x2x256xf32>
    %cst_20 = arith.constant 5.000000e-01 : f32
    %32 = vector.broadcast %cst_20 : f32 to vector<2x4x2x256xf32>
    %33 = arith.mulf %32, %31 : vector<2x4x2x256xf32>
    %34 = math.tanh %33 : vector<2x4x2x256xf32>
    %cst_21 = arith.constant 5.000000e-01 : f32
    %35 = vector.broadcast %cst_21 : f32 to vector<2x4x2x256xf32>
    %36 = arith.mulf %35, %34 : vector<2x4x2x256xf32>
    %cst_22 = arith.constant 5.000000e-01 : f32
    %37 = vector.broadcast %cst_22 : f32 to vector<2x4x2x256xf32>
    %38 = arith.addf %36, %37 : vector<2x4x2x256xf32>
    %39 = arith.mulf %0, %38 : vector<2x4x2x256xf32>
    %40 = vector.broadcast %6 : vector<1x4x2x1xf32> to vector<2x4x2x1xf32>
    %41 = vector.broadcast %29 : vector<2x4x1x1xf32> to vector<2x4x2x1xf32>
    %42 = arith.mulf %40, %41 : vector<2x4x2x1xf32>
    %43 = vector.broadcast %42 : vector<2x4x2x1xf32> to vector<2x4x2x256xf32>
    %44 = arith.mulf %39, %43 : vector<2x4x2x256xf32>
    %45 = vector.broadcast %9 : vector<1x4x2x1xf32> to vector<2x4x2x256xf32>
    %46 = arith.addf %44, %45 : vector<2x4x2x256xf32>
    %c0_23 = arith.constant 0 : index
    %c0_24 = arith.constant 0 : index
    %c0_25 = arith.constant 0 : index
    %c0_26 = arith.constant 0 : index
    %47 = vector.load %arg4[%c0_23, %c0_24, %c0_25, %c0_26] : memref<2x4x2x256xf32, #tpu.memory_space<vmem>>, vector<2x4x2x256xf32>
    tpu.vector_store %arg4[%c0_23, %c0_24, %c0_25, %c0_26], %46 {strides = array<i32>} : memref<2x4x2x256xf32, #tpu.memory_space<vmem>>, vector<2x4x2x256xf32>,
    return
  }
  func.func @transform_0(%arg0: i32, %arg1: i32) -> (i32, i32, i32, i32) {
    %c0_i32 = arith.constant 0 : i32
    %c0_i32_0 = arith.constant 0 : i32
    %c0_i32_1 = arith.constant 0 : i32
    return %arg1, %arg0, %c0_i32, %c0_i32_0 : i32, i32, i32, i32
  }
  func.func @transform_1(%arg0: i32, %arg1: i32) -> (i32, i32, i32, i32) {
    %c0_i32 = arith.constant 0 : i32
    %c0_i32_0 = arith.constant 0 : i32
    %c0_i32_1 = arith.constant 0 : i32
    %c0_i32_2 = arith.constant 0 : i32
    return %c0_i32, %arg0, %c0_i32_0, %c0_i32_1 : i32, i32, i32, i32
  }
  func.func @transform_2(%arg0: i32, %arg1: i32) -> (i32, i32, i32, i32) {
    %c0_i32 = arith.constant 0 : i32
    %c0_i32_0 = arith.constant 0 : i32
    %c0_i32_1 = arith.constant 0 : i32
    return %arg1, %arg0, %c0_i32, %c0_i32_0 : i32, i32, i32, i32
  }
}

</mosaic_0001>

<bundles_post_ra>
// kernel: tpu_custom_call.1
= control target key start
LH: loop header
LB: loop body
LE: loop exit
PB: predicated region body
PF: predicated region fallthrough
CT: control target
= control target key end

     0   :  { %7 = vsyncpa [#allocation3], 0  ;;  %s1317_s0 = inlined_call_operand.hbm [shape: f32[2,4,2,256], index: 0, kind: input, shape index: {}]   ;;  %s1318_s1 = inlined_call_operand.hbm [shape: f32[3,4,2,1], index: 1, kind: input, shape index: {}]   ;;  %s1319_s2 = inlined_call_operand.hbm [shape: f32[2,4,2,256], index: 2, kind: output, shape index: {}]  }
   0x1   :  { %8 = vsyncpa [#allocation6], 0 }
   0x2   :  { %9 = vsyncpa [#allocation4], 0  ;;  %s1017_s9 = smov [#allocation2]   ;;  %s945_s13 = scalar_lea.hbm %s1317_s0, 512 }
   0x3   :  { %s15_s10 = sshll.u32 %s1017_s9, 4  ;;  %p946_p0 = scmp.ne.s32.totalorder %s1317_s0, %s945_s13  ;;  %s16_s10 = int_to_ptr.vmem [resolvable:$true] %s15_s10 }
   0x4   :  { %p949_p1 = scmp.lt.u32.totalorder %s945_s13, %s1317_s0 }
   0x6   :  { %p951_p2 = pnand %p949_p1, %p946_p0 }
   0x8   :  { %954 = shalt.err (!%p951_p2)
}
   0x9   :  { %s955_s18 = scalar_lea.vmem %s16_s10, 512  ;;  %p960_p4 = scmp.lt.s32.totalorder %s16_s10, %s16_s10 }
   0xa   :  { %p956_p3 = scmp.ne.s32.totalorder %s16_s10, %s955_s18  ;;  %p961_p5 = scmp.lt.s32.totalorder %s955_s18, %s955_s18 }
   0xc   :  { %p962_p6 = por %p961_p5, %p960_p4 }
   0xe   :  { %p963_p7 = pnand %p962_p6, %p956_p3 }
  0x10   :  { %966 = shalt.err (!%p963_p7)
}
  0x11   :  { %s1018_s19 = smov 64   ;;  %s1019_s20 = smov 4  }
  0x12   :  { %21 = dma.hbm_to_vmem [thread:$0]  %s1317_s0, 512, %s16_s10, [#allocation3], %s1018_s19, %s1018_s19, %s1019_s20  }
  0x13   :  { %s1020_s23 = smov [#allocation5]   ;;  %s967_s27 = scalar_lea.hbm %s1318_s1, 384 }
  0x14   :  { %s27_s24 = sshll.u32 %s1020_s23, 4  ;;  %p968_p8 = scmp.ne.s32.totalorder %s1318_s1, %s967_s27  ;;  %s28_s24 = int_to_ptr.vmem [resolvable:$true] %s27_s24 }
  0x15   :  { %p971_p9 = scmp.lt.u32.totalorder %s967_s27, %s1318_s1 }
  0x17   :  { %p973_p10 = pnand %p971_p9, %p968_p8 }
  0x19   :  { %976 = shalt.err (!%p973_p10)
}
  0x1a   :  { %s977_s4 = scalar_lea.vmem %s28_s24, 384  ;;  %p982_p12 = scmp.lt.s32.totalorder %s28_s24, %s28_s24 }
  0x1b   :  { %p978_p11 = scmp.ne.s32.totalorder %s28_s24, %s977_s4  ;;  %p983_p13 = scmp.lt.s32.totalorder %s977_s4, %s977_s4 }
  0x1d   :  { %p984_p0 = por %p983_p13, %p982_p12 }
  0x1f   :  { %p985_p1 = pnand %p984_p0, %p978_p11 }
  0x21   :  { %988 = shalt.err (!%p985_p1)
}
  0x22   :  { %s1021_s0 = smov 32   ;;  %s1022_s5 = smov 2  }
  0x23   :  { %33 = dma.hbm_to_vmem [thread:$0]  %s1318_s1, 384, %s28_s24, [#allocation6], %s1021_s0, %s1021_s0, %s1022_s5  }
  0x24   :  { %1011 = dma.done.wait [#allocation3], 512  }
  0x25   :  { %1012 = vsyncadd [#allocation3], 4294966784 }
  0x26   :  { %1013 = dma.done.wait [#allocation6], 384  }
  0x27   :  { %1014 = vsyncadd [#allocation6], 4294966912  ;;  %v73_v0 = vlaneseq  ;;  %v1023_v1 = vmov 1983009808   ;;  %vm150_vm0 = vcmask 1041408   ;;  %s1026_s1 = smov [#allocation7]  }
  0x28   :  { %v71_v2 = vunpack.c.l.s4 %v1023_v1  ;;  %v1074_v6 = vld [vmem:[#allocation2 + $0x8] sm:$0xf]  ;;  %v1076_v7 = vld [vmem:[#allocation2] sm:$0xf]  ;;  %v1078_v8 = vld [vmem:[#allocation2 + $0xc] sm:$0xf] }
  0x29   :  { %v1069_v3 = vshrl.u32 %v73_v0, 7  ;;  %1322 = vst [vmem:[#allocation11_spill] sm:$0xff] %v1074_v6  ;;  %v1092_v12 = vld [vmem:[#allocation2 + $0x4] sm:$0xf]  ;;  %v1094_v13 = vld [vmem:[#allocation2 + $0x14] sm:$0xf]  ;;  %v247_v18 = vmul.f32 %v1076_v7, %v1076_v7  ;;  %v250_v48 = vmul.f32 %v1078_v8, %v1078_v8  ;;  %v249_v1 = vmul.f32 %v1074_v6, %v1074_v6 }
  0x2a   :  { %v72_v4 = vunpack.c.0.s8 %v71_v2  ;;  %v1096_v14 = vld [vmem:[#allocation2 + $0x10] sm:$0xf]  ;;  %v1134_v26 = vld [vmem:[#allocation2 + $0x1c] sm:$0xf]  ;;  %v248_v27 = vmul.f32 %v1092_v12, %v1092_v12  ;;  %v1148_v32 = vld [vmem:[#allocation2 + $0x18] sm:$0xf]  ;;  %v252_v2 = vmul.f32 %v1094_v13, %v1094_v13 }
  0x2b   :  { %1323 = vst [vmem:[#allocation12_spill] sm:$0xff] %v1148_v32  ;;  %s872_s8 = sshll.u32 %s1026_s1, 4  ;;  %s873_s8 = int_to_ptr.vmem [resolvable:$true] %s872_s8 }
  0x2c   :  { %v1072_v5 = vsub.s32 %v72_v4, %v1069_v3  ;;  %v251_v4 = vmul.f32 %v1096_v14, %v1096_v14  ;;  %s989_s9 = scalar_lea.vmem %s873_s8, 512  ;;  %p994_p3 = scmp.lt.s32.totalorder %s873_s8, %s873_s8 }
  0x2d   :  { %p990_p2 = scmp.ne.s32.totalorder %s873_s8, %s989_s9  ;;  %p995_p4 = scmp.lt.s32.totalorder %s989_s9, %s989_s9 }
  0x2e   :  { %v1082_v9 = vrot.slane %v1074_v6, %v1072_v5  ;;  %v1086_v10 = vrot.slane %v1076_v7, %v1072_v5  ;;  %v1090_v11 = vrot.slane %v1078_v8, %v1072_v5  ;;  %v1100_v15 = vrot.slane %v1092_v12, %v1072_v5 }
  0x2f   :  { %v1104_v16 = vrot.slane %v1094_v13, %v1072_v5  ;;  %v1108_v17 = vrot.slane %v1096_v14, %v1072_v5  ;;  %v1166_v43 = vrot.slane %v1134_v26, %v1072_v5  ;;  %v1170_v44 = vrot.slane %v1148_v32, %v1072_v5  ;;  %p996_p5 = por %p995_p4, %p994_p3 }
  0x30   :  { %v1114_v19 = vcombine.high %v1082_v9, %v1082_v9  ;;  %v161_v20 = vsel %vm150_vm0, %v1082_v9, 0.0  ;;  %v1120_v21 = vcombine.high %v1086_v10, %v1086_v10  ;;  %v151_v22 = vsel %vm150_vm0, %v1086_v10, 0.0 }
  0x31   :  { %v1126_v23 = vcombine.high %v1090_v11, %v1090_v11  ;;  %v166_v24 = vsel %vm150_vm0, %v1090_v11, 0.0  ;;  %v1132_v25 = vcombine.high %v1100_v15, %v1100_v15  ;;  %v156_v30 = vsel %vm150_vm0, %v1100_v15, 0.0  ;;  %p997_p6 = pnand %p996_p5, %p990_p2 }
  0x32   :  { %v162_v28 = vsel %vm150_vm0, %v1114_v19, 0.0  ;;  %v152_v29 = vsel %vm150_vm0, %v1120_v21, 0.0  ;;  %v1146_v31 = vcombine.high %v1104_v16, %v1104_v16  ;;  %v176_v38 = vsel %vm150_vm0, %v1104_v16, 0.0 }
  0x33   :  { %v163_v33 = vadd.f32 %v162_v28, %v161_v20  ;;  %v153_v34 = vadd.f32 %v152_v29, %v151_v22  ;;  %v167_v35 = vsel %vm150_vm0, %v1126_v23, 0.0  ;;  %v157_v36 = vsel %vm150_vm0, %v1132_v25, 0.0 }
  0x34   :  { %v168_v37 = vadd.f32 %v167_v35, %v166_v24  ;;  %v177_v39 = vsel %vm150_vm0, %v1146_v31, 0.0  ;;  %v1160_v40 = vcombine.high %v1108_v17, %v1108_v17  ;;  %v158_v41 = vadd.f32 %v157_v36, %v156_v30 }
  0x35   :  { %164 = vadd.xlane.f32.xlu1 %v163_v33  ;;  %154 = vadd.xlane.f32.xlu0 %v153_v34  ;;  %v171_v42 = vsel %vm150_vm0, %v1108_v17, 0.0  ;;  %v277_v46 = vrot.slane %v248_v27, %v1072_v5  ;;  %v269_v47 = vrot.slane %v247_v18, %v1072_v5  ;;  %v178_v49 = vadd.f32 %v177_v39, %v176_v38 }
  0x36   :  { %v172_v45 = vsel %vm150_vm0, %v1160_v40, 0.0  ;;  %v1180_v50 = vcombine.high %v1166_v43, %v1166_v43  ;;  %v1184_v51 = vcombine.high %v1170_v44, %v1170_v44  ;;  %v186_v53 = vsel %vm150_vm0, %v1166_v43, 0.0 }
  0x37   :  { %v173_v52 = vadd.f32 %v172_v45, %v171_v42  ;;  %v181_v54 = vsel %vm150_vm0, %v1170_v44, 0.0  ;;  %v278_v55 = vcombine.high %v277_v46, %v277_v46  ;;  %v270_v58 = vcombine.high %v269_v47, %v269_v47 }
  0x38   :  { %v187_v56 = vsel %vm150_vm0, %v1180_v50, 0.0  ;;  %v182_v57 = vsel %vm150_vm0, %v1184_v51, 0.0  ;;  %v293_v59 = vrot.slane %v250_v48, %v1072_v5  ;;  %v348_v62 = vsel %vm150_vm0, %v277_v46, 0.0 }
  0x39   :  { %169 = vadd.xlane.f32.xlu1 %v168_v37  ;;  %159 = vadd.xlane.f32.xlu0 %v158_v41  ;;  %v188_v60 = vadd.f32 %v187_v56, %v186_v53  ;;  %v183_v61 = vadd.f32 %v182_v57, %v181_v54  ;;  %v343_v63 = vsel %vm150_vm0, %v269_v47, 0.0  ;;  %v349_v0 = vsel %vm150_vm0, %v278_v55, 0.0 }
  0x3a   :  { %v344_v18 = vsel %vm150_vm0, %v270_v58, 0.0  ;;  %v294_v20 = vcombine.high %v293_v59, %v293_v59  ;;  %v254_v22 = vmul.f32 %v1134_v26, %v1134_v26  ;;  %v253_v24 = vmul.f32 %v1148_v32, %v1148_v32 }
  0x3b   :  { %v285_v27 = vrot.slane %v249_v1, %v1072_v5  ;;  %v309_v28 = vrot.slane %v252_v2, %v1072_v5  ;;  %v301_v29 = vrot.slane %v251_v4, %v1072_v5  ;;  %v350_v30 = vadd.f32 %v349_v0, %v348_v62  ;;  %v49_v1 = vld [vmem:[#allocation5 + $0x2] sm:$0x3]  ;;  %v50_v2 = vld [vmem:[#allocation5 + $0x4] sm:$0x3]  ;;  %v48_v4 = vld [vmem:[#allocation5] sm:$0x3] }
  0x3c   :  { %v345_v33 = vadd.f32 %v344_v18, %v343_v63  ;;  %v358_v35 = vsel %vm150_vm0, %v293_v59, 0.0  ;;  %v359_v36 = vsel %vm150_vm0, %v294_v20, 0.0  ;;  %v325_v37 = vrot.slane %v254_v22, %v1072_v5  ;;  %v51_v18 = vld [vmem:[#allocation5 + $0x6] sm:$0x3]  ;;  %v58_v20 = vld [vmem:[#allocation5 + $0x10] sm:$0x3] }
  0x3d   :  { %179 = vadd.xlane.f32.xlu1 %v178_v49  ;;  %174 = vadd.xlane.f32.xlu0 %v173_v52  ;;  %v286_v34 = vcombine.high %v285_v27, %v285_v27  ;;  %v317_v38 = vrot.slane %v253_v24, %v1072_v5  ;;  %v353_v39 = vsel %vm150_vm0, %v285_v27, 0.0  ;;  %v310_v42 = vcombine.high %v309_v28, %v309_v28  ;;  %v59_v22 = vld [vmem:[#allocation5 + $0x12] sm:$0x3] }
  0x3e   :  { %v302_v45 = vcombine.high %v301_v29, %v301_v29  ;;  %v360_v46 = vadd.f32 %v359_v36, %v358_v35  ;;  %v368_v48 = vsel %vm150_vm0, %v309_v28, 0.0  ;;  %v363_v49 = vsel %vm150_vm0, %v301_v29, 0.0 }
  0x3f   :  { %v354_v41 = vsel %vm150_vm0, %v286_v34, 0.0  ;;  %v369_v52 = vsel %vm150_vm0, %v310_v42, 0.0  ;;  %v326_v54 = vcombine.high %v325_v37, %v325_v37  ;;  %v318_v55 = vcombine.high %v317_v38, %v317_v38 }
  0x40   :  { %v355_v47 = vadd.f32 %v354_v41, %v353_v39  ;;  %v364_v53 = vsel %vm150_vm0, %v302_v45, 0.0  ;;  %v370_v56 = vadd.f32 %v369_v52, %v368_v48  ;;  %v378_v58 = vsel %vm150_vm0, %v325_v37, 0.0 }
  0x41   :  { %189 = vadd.xlane.f32.xlu1 %v188_v60  ;;  %184 = vadd.xlane.f32.xlu0 %v183_v61  ;;  %v365_v57 = vadd.f32 %v364_v53, %v363_v49  ;;  %v379_v59 = vsel %vm150_vm0, %v326_v54, 0.0  ;;  %v373_v60 = vsel %vm150_vm0, %v317_v38, 0.0  ;;  %v374_v61 = vsel %vm150_vm0, %v318_v55, 0.0 }
  0x42   :  { %v380_v62 = vadd.f32 %v379_v59, %v378_v58  ;;  %v375_v63 = vadd.f32 %v374_v61, %v373_v60  ;;  %v1024_v0 = vmov 0  }
  0x43   :  { %896 = vset.pattern.permute.xlu1 %v1024_v0  ;;  %895 = vset.pattern.permute.xlu0 %v1024_v0 }
  0x45   :  { %351 = vadd.xlane.f32.xlu1 %v350_v30  ;;  %346 = vadd.xlane.f32.xlu0 %v345_v33 }
  0x49   :  { %361 = vadd.xlane.f32.xlu1 %v360_v46  ;;  %356 = vadd.xlane.f32.xlu0 %v355_v47 }
  0x4d   :  { %371 = vadd.xlane.f32.xlu1 %v370_v56  ;;  %366 = vadd.xlane.f32.xlu0 %v365_v57 }
  0x51   :  { %381 = vadd.xlane.f32.xlu1 %v380_v62  ;;  %376 = vadd.xlane.f32.xlu0 %v375_v63 }
  0x62   :  { %502 = vperm.xlu1 %896, %v49_v1  }
  0x66   :  { %507 = vperm.xlu1 %896, %v50_v2  }
  0x67   :  { %497 = vperm.xlu0 %895, %v48_v4  }
  0x6a   :  { %512 = vperm.xlu1 %896, %v51_v18  }
  0x6b   :  { %809 = vperm.xlu0 %895, %v59_v22  }
  0x6e   :  { %805 = vperm.xlu1 %896, %v58_v20  }
  0xc2   :  { %v165_v24 = vpop.xlane.xlu1 %164  ;;  %v155_v27 = vpop.xlane.xlu0 %154 }
  0xc3   :  { %v205_v28 = vsel %vm150_vm0, %v165_v24, 0.0  ;;  %v191_v29 = vsel %vm150_vm0, %v155_v27, 0.0 }
  0xc4   :  { %v206_v30 = vrot.slane %v205_v28, 4  ;;  %v192_v33 = vrot.slane %v191_v29, 4 }
  0xc6   :  { %v207_v34 = vadd.f32 %v206_v30, %v205_v28  ;;  %v193_v35 = vadd.f32 %v192_v33, %v191_v29  ;;  %v170_v36 = vpop.xlane.xlu1 %169  ;;  %v160_v37 = vpop.xlane.xlu0 %159 }
  0xc7   :  { %v212_v38 = vsel %vm150_vm0, %v170_v36, 0.0  ;;  %v198_v39 = vsel %vm150_vm0, %v160_v37, 0.0 }
  0xc8   :  { %v208_v41 = vrot.slane %v207_v34, 2  ;;  %v194_v42 = vrot.slane %v193_v35, 2  ;;  %v213_v45 = vrot.slane %v212_v38, 4  ;;  %v199_v46 = vrot.slane %v198_v39, 4 }
  0xca   :  { %v209_v47 = vadd.f32 %v208_v41, %v207_v34  ;;  %v195_v48 = vadd.f32 %v194_v42, %v193_v35  ;;  %v214_v49 = vadd.f32 %v213_v45, %v212_v38  ;;  %v200_v52 = vadd.f32 %v199_v46, %v198_v39  ;;  %v180_v53 = vpop.xlane.xlu1 %179  ;;  %v175_v54 = vpop.xlane.xlu0 %174 }
  0xcb   :  { %v226_v55 = vsel %vm150_vm0, %v180_v53, 0.0  ;;  %v219_v56 = vsel %vm150_vm0, %v175_v54, 0.0 }
  0xcc   :  { %v210_v57 = vrot.slane %v209_v47, 1  ;;  %v196_v58 = vrot.slane %v195_v48, 1  ;;  %v215_v59 = vrot.slane %v214_v49, 2  ;;  %v201_v60 = vrot.slane %v200_v52, 2 }
  0xcd   :  { %v227_v61 = vrot.slane %v226_v55, 4  ;;  %v220_v62 = vrot.slane %v219_v56, 4 }
  0xce   :  { %v216_v63 = vadd.f32 %v215_v59, %v214_v49  ;;  %v202_v0 = vadd.f32 %v201_v60, %v200_v52  ;;  %v190_v1 = vpop.xlane.xlu1 %189  ;;  %v185_v2 = vpop.xlane.xlu0 %184  ;;  %v211_v24 = vadd.f32 %v210_v57, %v209_v47  ;;  %v197_v27 = vadd.f32 %v196_v58, %v195_v48 }
  0xcf   :  { %v228_v4 = vadd.f32 %v227_v61, %v226_v55  ;;  %v221_v18 = vadd.f32 %v220_v62, %v219_v56  ;;  %v240_v20 = vsel %vm150_vm0, %v190_v1, 0.0  ;;  %v233_v22 = vsel %vm150_vm0, %v185_v2, 0.0 }
  0xd0   :  { %v217_v28 = vrot.slane %v216_v63, 1  ;;  %v203_v29 = vrot.slane %v202_v0, 1  ;;  %v241_v34 = vrot.slane %v240_v20, 4  ;;  %v234_v35 = vrot.slane %v233_v22, 4 }
  0xd1   :  { %v229_v30 = vrot.slane %v228_v4, 2  ;;  %v222_v33 = vrot.slane %v221_v18, 2  ;;  %v441_v49 = vmul.f32 %v211_v24, %v211_v24  ;;  %v439_v52 = vmul.f32 %v197_v27, %v197_v27 }
  0xd2   :  { %v218_v36 = vadd.f32 %v217_v28, %v216_v63  ;;  %v204_v37 = vadd.f32 %v203_v29, %v202_v0  ;;  %v352_v38 = vpop.xlane.xlu1 %351  ;;  %v347_v39 = vpop.xlane.xlu0 %346  ;;  %v242_v45 = vadd.f32 %v241_v34, %v240_v20  ;;  %v235_v46 = vadd.f32 %v234_v35, %v233_v22 }
  0xd3   :  { %v230_v41 = vadd.f32 %v229_v30, %v228_v4  ;;  %v223_v42 = vadd.f32 %v222_v33, %v221_v18  ;;  %v390_v53 = vsel %vm150_vm0, %v352_v38, 0.0  ;;  %v383_v47 = vsel %vm150_vm0, %v347_v39, 0.0 }
  0xd4   :  { %v243_v55 = vrot.slane %v242_v45, 2  ;;  %v236_v56 = vrot.slane %v235_v46, 2  ;;  %v442_v57 = vmul.f32 %v218_v36, %v218_v36  ;;  %v440_v58 = vmul.f32 %v204_v37, %v204_v37 }
  0xd5   :  { %v231_v48 = vrot.slane %v230_v41, 1  ;;  %v224_v54 = vrot.slane %v223_v42, 1  ;;  %v391_v59 = vrot.slane %v390_v53, 4  ;;  %v384_v60 = vrot.slane %v383_v47, 4 }
  0xd6   :  { %v362_v61 = vpop.xlane.xlu1 %361  ;;  %v357_v62 = vpop.xlane.xlu0 %356  ;;  %v244_v1 = vadd.f32 %v243_v55, %v242_v45  ;;  %v237_v2 = vadd.f32 %v236_v56, %v235_v46  ;;  %v1238_v24 = vmul.f32 0.001953125, %v441_v49  ;;  %v447_v27 = vmul.f32 0.001953125, %v439_v52 }
  0xd7   :  { %v232_v63 = vadd.f32 %v231_v48, %v230_v41  ;;  %v225_v0 = vadd.f32 %v224_v54, %v223_v42  ;;  %v392_v4 = vadd.f32 %v391_v59, %v390_v53  ;;  %v385_v18 = vadd.f32 %v384_v60, %v383_v47 }
  0xd8   :  { %v404_v20 = vsel %vm150_vm0, %v362_v61, 0.0  ;;  %v397_v22 = vsel %vm150_vm0, %v357_v62, 0.0  ;;  %v450_v38 = vmul.f32 0.001953125, %v442_v57  ;;  %v448_v39 = vmul.f32 0.001953125, %v440_v58 }
  0xd9   :  { %v444_v28 = vmul.f32 %v232_v63, %v232_v63  ;;  %v443_v29 = vmul.f32 %v225_v0, %v225_v0  ;;  %v393_v30 = vrot.slane %v392_v4, 2  ;;  %v386_v33 = vrot.slane %v385_v18, 2 }
  0xda   :  { %v405_v34 = vrot.slane %v404_v20, 4  ;;  %v398_v35 = vrot.slane %v397_v22, 4  ;;  %v372_v36 = vpop.xlane.xlu1 %371  ;;  %v367_v37 = vpop.xlane.xlu0 %366  ;;  %v245_v41 = vrot.slane %v244_v1, 1  ;;  %v238_v42 = vrot.slane %v237_v2, 1 }
  0xdb   :  { %v394_v45 = vadd.f32 %v393_v30, %v392_v4  ;;  %v387_v46 = vadd.f32 %v386_v33, %v385_v18  ;;  %v1240_v48 = vmul.f32 0.001953125, %v444_v28  ;;  %v1242_v49 = vmul.f32 0.001953125, %v443_v29 }
  0xdc   :  { %v406_v53 = vadd.f32 %v405_v34, %v404_v20  ;;  %v399_v47 = vadd.f32 %v398_v35, %v397_v22  ;;  %v418_v52 = vsel %vm150_vm0, %v372_v36, 0.0  ;;  %v411_v54 = vsel %vm150_vm0, %v367_v37, 0.0 }
  0xdd   :  { %v395_v55 = vrot.slane %v394_v45, 1  ;;  %v388_v56 = vrot.slane %v387_v46, 1  ;;  %v246_v61 = vadd.f32 %v245_v41, %v244_v1  ;;  %v239_v62 = vadd.f32 %v238_v42, %v237_v2 }
  0xde   :  { %v407_v59 = vrot.slane %v406_v53, 2  ;;  %v400_v60 = vrot.slane %v399_v47, 2  ;;  %v382_v57 = vpop.xlane.xlu1 %381  ;;  %v377_v58 = vpop.xlane.xlu0 %376  ;;  %v419_v63 = vrot.slane %v418_v52, 4  ;;  %v412_v0 = vrot.slane %v411_v54, 4 }
  0xdf   :  { %v396_v4 = vadd.f32 %v395_v55, %v394_v45  ;;  %v389_v18 = vadd.f32 %v388_v56, %v387_v46  ;;  %v432_v30 = vsel %vm150_vm0, %v382_v57, 0.0  ;;  %v425_v33 = vsel %vm150_vm0, %v377_v58, 0.0 }
  0xe0   :  { %v408_v20 = vadd.f32 %v407_v59, %v406_v53  ;;  %v401_v22 = vadd.f32 %v400_v60, %v399_v47  ;;  %v420_v28 = vadd.f32 %v419_v63, %v418_v52  ;;  %v413_v29 = vadd.f32 %v412_v0, %v411_v54 }
  0xe1   :  { %v456_v34 = vsub.f32 %v396_v4, %v448_v39  ;;  %v455_v35 = vsub.f32 %v389_v18, %v447_v27  ;;  %v433_v1 = vrot.slane %v432_v30, 4  ;;  %v426_v2 = vrot.slane %v425_v33, 4 }
  0xe2   :  { %v409_v36 = vrot.slane %v408_v20, 1  ;;  %v402_v37 = vrot.slane %v401_v22, 1  ;;  %v421_v32 = vrot.slane %v420_v28, 2  ;;  %v414_v6 = vrot.slane %v413_v29, 2 }
  0xe3   :  { %v464_v41 = vmul.f32 0.0019569471, %v456_v34  ;;  %v463_v42 = vmul.f32 0.0019569471, %v455_v35  ;;  %v434_v52 = vadd.f32 %v433_v1, %v432_v30  ;;  %v427_v54 = vadd.f32 %v426_v2, %v425_v33 }
  0xe4   :  { %v410_v45 = vadd.f32 %v409_v36, %v408_v20  ;;  %v403_v46 = vadd.f32 %v402_v37, %v401_v22  ;;  %v422_v53 = vadd.f32 %v421_v32, %v420_v28  ;;  %v415_v47 = vadd.f32 %v414_v6, %v413_v29 }
  0xe5   :  { %v472_v55 = vmax.f32 %v464_v41, 0.0  ;;  %v471_v56 = vmax.f32 %v463_v42, 0.0  ;;  %v435_v57 = vrot.slane %v434_v52, 2  ;;  %v428_v58 = vrot.slane %v427_v54, 2 }
  0xe6   :  { %v458_v59 = vsub.f32 %v410_v45, %v450_v38  ;;  %v457_v39 = vsub.f32 %v403_v46, %v1238_v24  ;;  %v423_v27 = vrot.slane %v422_v53, 1  ;;  %v416_v60 = vrot.slane %v415_v47, 1 }
  0xe7   :  { %v480_v63 = vadd.f32 1e-05, %v472_v55  ;;  %v479_v0 = vadd.f32 1e-05, %v471_v56  ;;  %v436_v22 = vadd.f32 %v435_v57, %v434_v52  ;;  %v446_v32 = vmul.f32 %v246_v61, %v246_v61 }
  0xe8   :  { %v466_v4 = vmul.f32 0.0019569471, %v458_v59  ;;  %v465_v18 = vmul.f32 0.0019569471, %v457_v39  ;;  %v424_v34 = vadd.f32 %v423_v27, %v422_v53  ;;  %v417_v20 = vadd.f32 %v416_v60, %v415_v47 }
  0xe9   :  { %v445_v6 = vmul.f32 %v239_v62, %v239_v62  ;;  %v429_v28 = vadd.f32 %v428_v58, %v427_v54  ;;  %897 = vrsqrt.f32 %v479_v0  ;;  %v437_v33 = vrot.slane %v436_v22, 1  ;;  %v53_v54 = vld [vmem:[#allocation5 + $0x8] sm:$0x3]  ;;  %v54_v58 = vld [vmem:[#allocation5 + $0xa] sm:$0x3] }
  0xea   :  { %v473_v29 = vmax.f32 %v465_v18, 0.0  ;;  %v460_v38 = vsub.f32 %v424_v34, %v1240_v48  ;;  %v459_v24 = vsub.f32 %v417_v20, %v1242_v49  ;;  %v474_v30 = vmax.f32 %v466_v4, 0.0  ;;  %v55_v18 = vld [vmem:[#allocation5 + $0xc] sm:$0x3] }
  0xeb   :  { %v430_v35 = vrot.slane %v429_v28, 1  ;;  %899 = vrsqrt.f32 %v480_v63  ;;  %v454_v2 = vmul.f32 0.001953125, %v446_v32  ;;  %v453_v41 = vmul.f32 0.001953125, %v445_v6  ;;  %v56_v6 = vld [vmem:[#allocation5 + $0xe] sm:$0x3] }
  0xec   :  { %v481_v36 = vadd.f32 1e-05, %v473_v29  ;;  %v468_v37 = vmul.f32 0.0019569471, %v460_v38  ;;  %v467_v1 = vmul.f32 0.0019569471, %v459_v24  ;;  %v438_v42 = vadd.f32 %v437_v33, %v436_v22 }
  0xed   :  { %v431_v45 = vadd.f32 %v430_v35, %v429_v28  ;;  %v482_v53 = vadd.f32 1e-05, %v474_v30  ;;  %v61_v30 = vld [vmem:[#allocation5 + $0x16] sm:$0x3] }
  0xee   :  { %v476_v61 = vmax.f32 %v468_v37, 0.0  ;;  %v462_v62 = vsub.f32 %v438_v42, %v454_v2  ;;  %901 = vrsqrt.f32 %v481_v36  ;;  %v475_v48 = vmax.f32 %v467_v1, 0.0  ;;  %v60_v37 = vld [vmem:[#allocation5 + $0x14] sm:$0x3]  ;;  %v498_v1 = vpop.permute.xlu0 %497  ;;  %v503_v42 = vpop.permute.xlu1 %502 }
  0xef   :  { %v461_v46 = vsub.f32 %v431_v45, %v453_v41  ;;  %v515_v2 = vmul.f32 %v498_v1, %v1086_v10  ;;  %v516_v41 = vmul.f32 %v498_v1, %v1120_v21  ;;  %v517_v45 = vmul.f32 %v503_v42, %v1100_v15 }
  0xf0   :  { %v484_v47 = vadd.f32 1e-05, %v476_v61  ;;  %v470_v52 = vmul.f32 0.0019569471, %v462_v62  ;;  %v483_v59 = vadd.f32 1e-05, %v475_v48  ;;  %v518_v61 = vmul.f32 %v503_v42, %v1132_v25 }
  0xf1   :  { %v469_v49 = vmul.f32 0.0019569471, %v461_v46  ;;  %v531_v62 = vmul.f32 0.5, %v515_v2  ;;  %v532_v46 = vmul.f32 0.5, %v516_v41  ;;  %v524_v15 = vmul.f32 %v498_v1, %v1160_v40 }
  0xf2   :  { %903 = vrsqrt.f32 %v484_v47  ;;  %v478_v55 = vmax.f32 %v470_v52, 0.0  ;;  %v525_v47 = vmul.f32 %v503_v42, %v1104_v16  ;;  %v534_v48 = vmul.f32 0.5, %v518_v61  ;;  %v508_v52 = vpop.permute.xlu1 %507 }
  0xf3   :  { %v898_v56 = vpop.eup %897  ;;  %905 = vrsqrt.f32 %v482_v53  ;;  %v477_v39 = vmax.f32 %v469_v49, 0.0  ;;  %v533_v53 = vmul.f32 0.5, %v517_v45  ;;  %v526_v49 = vmul.f32 %v503_v42, %v1146_v31 }
  0xf4   :  { %v486_v27 = vadd.f32 1e-05, %v478_v55  ;;  %v691_v60 = vmul.f32 %v898_v56, %v53_v54  ;;  %v541_v10 = vmul.f32 0.5, %v525_v47  ;;  %v519_v40 = vmul.f32 %v508_v52, %v1082_v9 }
  0xf5   :  { %v900_v57 = vpop.eup %899  ;;  %v485_v63 = vadd.f32 1e-05, %v477_v39  ;;  %v542_v21 = vmul.f32 0.5, %v526_v49  ;;  %v540_v39 = vmul.f32 0.5, %v524_v15 }
  0xf6   :  { %907 = vrsqrt.f32 %v486_v27  ;;  %701 = vperm.xlu1 %896, %v691_v60   ;;  %v692_v0 = vmul.f32 %v900_v57, %v54_v58  ;;  %v513_v25 = vpop.permute.xlu1 %512  ;;  %v535_v9 = vmul.f32 0.5, %v519_v40  ;;  %v810_v40 = vpop.permute.xlu0 %809 }
  0xf7   :  { %909 = vrsqrt.f32 %v483_v59  ;;  %v521_v55 = vmul.f32 %v513_v25, %v1090_v11  ;;  %v522_v16 = vmul.f32 %v513_v25, %v1126_v23  ;;  %v529_v59 = vmul.f32 %v513_v25, %v1166_v43 }
  0xf8   :  { %v902_v4 = vpop.eup %901  ;;  %911 = vrsqrt.f32 %v485_v63  ;;  %v530_v27 = vmul.f32 %v513_v25, %v1180_v50  ;;  %v527_v43 = vmul.f32 %v508_v52, %v1170_v44 }
  0xf9   :  { %v693_v22 = vmul.f32 %v902_v4, %v55_v18  ;;  %913 = vtanh.f32 %v531_v62  ;;  %v537_v57 = vmul.f32 0.5, %v521_v55  ;;  %v545_v63 = vmul.f32 0.5, %v529_v59 }
  0xfa   :  { %705 = vperm.xlu1 %896, %v692_v0   ;;  %915 = vtanh.f32 %v532_v46  ;;  %v546_v4 = vmul.f32 0.5, %v530_v27  ;;  %v806_v47 = vpop.permute.xlu1 %805 }
  0xfb   :  { %917 = vtanh.f32 %v533_v53 }
  0xfc   :  { %v904_v34 = vpop.eup %903  ;;  %919 = vtanh.f32 %v534_v48 }
  0xfd   :  { %v696_v20 = vmul.f32 %v904_v34, %v54_v58  ;;  %v906_v32 = vpop.eup %905  ;;  %921 = vtanh.f32 %v541_v10  ;;  %v538_v58 = vmul.f32 0.5, %v522_v16 }
  0xfe   :  { %709 = vperm.xlu1 %896, %v693_v22   ;;  %v694_v29 = vmul.f32 %v906_v32, %v56_v6  ;;  %923 = vtanh.f32 %v542_v21 }
  0xff   :  { %721 = vperm.xlu0 %895, %v696_v20   ;;  %v528_v20 = vmul.f32 %v508_v52, %v1184_v51 }
 0x100   :  { %v908_v28 = vpop.eup %907 }
 0x101   :  { %v910_v38 = vpop.eup %909  ;;  %v698_v24 = vmul.f32 %v908_v28, %v56_v6 }
 0x102   :  { %713 = vperm.xlu1 %896, %v694_v29   ;;  %v695_v33 = vmul.f32 %v910_v38, %v53_v54  ;;  %v912_v35 = vpop.eup %911  ;;  %v523_v54 = vmul.f32 %v498_v1, %v1108_v17  ;;  %v543_v38 = vmul.f32 0.5, %v527_v43 }
 0x103   :  { %729 = vperm.xlu0 %895, %v698_v24   ;;  %v697_v36 = vmul.f32 %v912_v35, %v55_v18  ;;  %v914_v31 = vpop.eup %913  ;;  %v520_v18 = vmul.f32 %v508_v52, %v1114_v19  ;;  %v544_v19 = vmul.f32 0.5, %v528_v20 }
 0x104   :  { %v539_v56 = vmul.f32 0.5, %v523_v54  ;;  %v916_v60 = vpop.eup %915  ;;  %v563_v0 = vmul.f32 0.5, %v914_v31 }
 0x105   :  { %v918_v17 = vpop.eup %917  ;;  %v564_v23 = vmul.f32 0.5, %v916_v60  ;;  %v536_v29 = vmul.f32 0.5, %v520_v18 }
 0x106   :  { %717 = vperm.xlu1 %896, %v695_v33   ;;  %925 = vtanh.f32 %v539_v56  ;;  %v920_v11 = vpop.eup %919  ;;  %v565_v50 = vmul.f32 0.5, %v918_v17  ;;  %v579_v32 = vadd.f32 0.5, %v563_v0  ;;  %v1025_v33 = vmov 269488144  }
 0x107   :  { %817 = vperm.xlu0 %895, %v61_v30   ;;  %927 = vtanh.f32 %v540_v39  ;;  %v566_v34 = vmul.f32 0.5, %v920_v11  ;;  %v922_v22 = vpop.eup %921  ;;  %v580_v6 = vadd.f32 0.5, %v564_v23  ;;  %v732_v35 = vunpack.c.l.s4 %v1025_v33 }
 0x108   :  { %929 = vtanh.f32 %v537_v57  ;;  %v924_v28 = vpop.eup %923  ;;  %v581_v24 = vadd.f32 0.5, %v565_v50  ;;  %v573_v44 = vmul.f32 0.5, %v922_v22 }
 0x109   :  { %931 = vtanh.f32 %v538_v58  ;;  %v582_v30 = vadd.f32 0.5, %v566_v34  ;;  %v733_v41 = vunpack.c.0.s8 %v732_v35 }
 0x10a   :  { %725 = vperm.xlu1 %896, %v697_v36   ;;  %933 = vtanh.f32 %v545_v63  ;;  %v574_v36 = vmul.f32 0.5, %v924_v28  ;;  %v589_v61 = vadd.f32 0.5, %v573_v44 }
 0x10b   :  { %935 = vtanh.f32 %v546_v4  ;;  %v619_v42 = vcombine.low %v581_v24, %v582_v30  ;;  %v1269_v52 = vsub.s32 %v733_v41, %v1069_v3 }
 0x10c   :  { %937 = vtanh.f32 %v535_v9  ;;  %v590_v62 = vadd.f32 0.5, %v574_v36 }
 0x10d   :  { %939 = vtanh.f32 %v536_v29  ;;  %v626_v49 = vrot.slane %v619_v42, %v1072_v5  ;;  %v1275_v60 = vrot.slane %v806_v47, %v1269_v52  ;;  %v832_v9 = vrot.slane %v810_v40, %v1269_v52 }
 0x10e   :  { %813 = vperm.xlu1 %896, %v60_v37   ;;  %v611_v37 = vcombine.low %v579_v32, %v580_v6  ;;  %941 = vtanh.f32 %v543_v38  ;;  %v651_v15 = vcombine.low %v589_v61, %v590_v62 }
 0x10f   :  { %943 = vtanh.f32 %v544_v19  ;;  %v684_v3 = vmul.f32 %v626_v49, %v1092_v12 }
 0x110   :  { %v926_v1 = vpop.eup %925  ;;  %v618_v46 = vrot.slane %v611_v37, %v1072_v5  ;;  %v658_v63 = vrot.slane %v651_v15, %v1072_v5 }
 0x111   :  { %v928_v51 = vpop.eup %927  ;;  %v571_v10 = vmul.f32 0.5, %v926_v1 }
 0x112   :  { %v930_v2 = vpop.eup %929  ;;  %v572_v21 = vmul.f32 0.5, %v928_v51  ;;  %v683_v54 = vmul.f32 %v618_v46, %v1076_v7  ;;  %v688_v28 = vmul.f32 %v658_v63, %v1094_v13 }
 0x113   :  { %v932_v45 = vpop.eup %931  ;;  %v569_v25 = vmul.f32 0.5, %v930_v2  ;;  %v587_v58 = vadd.f32 0.5, %v571_v10 }
 0x114   :  { %v934_v53 = vpop.eup %933  ;;  %v570_v55 = vmul.f32 0.5, %v932_v45  ;;  %v588_v17 = vadd.f32 0.5, %v572_v21 }
 0x115   :  { %v936_v48 = vpop.eup %935  ;;  %v577_v16 = vmul.f32 0.5, %v934_v53  ;;  %v585_v0 = vadd.f32 0.5, %v569_v25 }
 0x116   :  { %v578_v56 = vmul.f32 0.5, %v936_v48  ;;  %v938_v31 = vpop.eup %937  ;;  %v586_v23 = vadd.f32 0.5, %v570_v55  ;;  %v643_v29 = vcombine.low %v587_v58, %v588_v17  ;;  %v1325_v17 = vld [vmem:[#allocation12_spill] sm:$0xff] }
 0x117   :  { %v940_v27 = vpop.eup %939  ;;  %v593_v4 = vadd.f32 0.5, %v577_v16  ;;  %v567_v50 = vmul.f32 0.5, %v938_v31 }
 0x118   :  { %v942_v57 = vpop.eup %941  ;;  %v594_v18 = vadd.f32 0.5, %v578_v56  ;;  %v568_v34 = vmul.f32 0.5, %v940_v27  ;;  %v635_v30 = vcombine.low %v585_v0, %v586_v23  ;;  %v650_v2 = vrot.slane %v643_v29, %v1072_v5 }
 0x119   :  { %v944_v11 = vpop.eup %943  ;;  %v575_v12 = vmul.f32 0.5, %v942_v57  ;;  %v583_v33 = vadd.f32 0.5, %v567_v50 }
 0x11a   :  { %v576_v32 = vmul.f32 0.5, %v944_v11  ;;  %v667_v19 = vcombine.low %v593_v4, %v594_v18  ;;  %v584_v35 = vadd.f32 0.5, %v568_v34  ;;  %v642_v41 = vrot.slane %v635_v30, %v1072_v5 }
 0x11b   :  { %v591_v37 = vadd.f32 0.5, %v575_v12  ;;  %v687_v47 = vmul.f32 %v650_v2, %v1096_v14 }
 0x11c   :  { %v592_v1 = vadd.f32 0.5, %v576_v32  ;;  %v674_v13 = vrot.slane %v667_v19, %v1072_v5  ;;  %v627_v45 = vcombine.low %v583_v33, %v584_v35  ;;  %v686_v49 = vmul.f32 %v642_v41, %v1078_v8 }
 0x11e   :  { %v659_v48 = vcombine.low %v591_v37, %v592_v1  ;;  %v690_v10 = vmul.f32 %v674_v13, %v1134_v26 }
 0x120   :  { %v666_v31 = vrot.slane %v659_v48, %v1072_v5 }
 0x122   :  { %v689_v40 = vmul.f32 %v666_v31, %v1325_v17 }
 0x175   :  { %v702_v59 = vpop.permute.xlu1 %701 }
 0x176   :  { %v737_v39 = vrot.slane %v702_v59, %v1269_v52 }
 0x178   :  { %v795_v7 = vmul.f32 %v737_v39, %v683_v54  ;;  %v634_v54 = vrot.slane %v627_v45, %v1072_v5 }
 0x179   :  { %v706_v43 = vpop.permute.xlu1 %705 }
 0x17a   :  { %v851_v20 = vadd.f32 %v1275_v60, %v795_v7  ;;  %v744_v22 = vrot.slane %v706_v43, %v1269_v52 }
 0x17c   :  { %859 = vst [vmem:[#allocation7] sm:$0xf] %v851_v20  ;;  %v796_v6 = vmul.f32 %v744_v22, %v684_v3  ;;  %v1324_v3 = vld [vmem:[#allocation11_spill] sm:$0xff] }
 0x17d   :  { %v710_v38 = vpop.permute.xlu1 %709  ;;  %v685_v8 = vmul.f32 %v634_v54, %v1324_v3 }
 0x17e   :  { %v722_v24 = vpop.permute.xlu0 %721  ;;  %v852_v44 = vadd.f32 %v832_v9, %v796_v6  ;;  %v751_v26 = vrot.slane %v710_v38, %v1269_v52 }
 0x17f   :  { %v772_v36 = vrot.slane %v722_v24, %v1269_v52 }
 0x180   :  { %860 = vst [vmem:[#allocation7 + $0x4] sm:$0xf] %v852_v44  ;;  %v797_v5 = vmul.f32 %v751_v26, %v685_v8 }
 0x181   :  { %v800_v51 = vmul.f32 %v772_v36, %v688_v28  ;;  %v714_v42 = vpop.permute.xlu1 %713 }
 0x182   :  { %v730_v62 = vpop.permute.xlu0 %729  ;;  %v758_v46 = vrot.slane %v714_v42, %v1269_v52 }
 0x183   :  { %v856_v61 = vadd.f32 %v832_v9, %v800_v51  ;;  %v786_v53 = vrot.slane %v730_v62, %v1269_v52 }
 0x184   :  { %v798_v55 = vmul.f32 %v758_v46, %v686_v49 }
 0x185   :  { %864 = vst [vmem:[#allocation7 + $0x14] sm:$0xf] %v856_v61  ;;  %v718_v21 = vpop.permute.xlu1 %717  ;;  %v802_v16 = vmul.f32 %v786_v53, %v690_v10 }
 0x186   :  { %v765_v15 = vrot.slane %v718_v21, %v1269_v52  ;;  %v818_v25 = vpop.permute.xlu0 %817 }
 0x187   :  { %v846_v56 = vrot.slane %v818_v25, %v1269_v52 }
 0x188   :  { %v799_v59 = vmul.f32 %v765_v15, %v687_v47 }
 0x189   :  { %v854_v39 = vadd.f32 %v846_v56, %v798_v55  ;;  %v858_v14 = vadd.f32 %v846_v56, %v802_v16  ;;  %v726_v27 = vpop.permute.xlu1 %725 }
 0x18a   :  { %v855_v57 = vadd.f32 %v1275_v60, %v799_v59  ;;  %v779_v58 = vrot.slane %v726_v27, %v1269_v52 }
 0x18b   :  { %862 = vst [vmem:[#allocation7 + $0xc] sm:$0xf] %v854_v39  ;;  %866 = vst [vmem:[#allocation7 + $0x1c] sm:$0xf] %v858_v14 }
 0x18c   :  { %863 = vst [vmem:[#allocation7 + $0x10] sm:$0xf] %v855_v57  ;;  %v801_v63 = vmul.f32 %v779_v58, %v689_v40 }
 0x18d   :  { %v814_v7 = vpop.permute.xlu1 %813 }
 0x18e   :  { %v839_v11 = vrot.slane %v814_v7, %v1269_v52 }
 0x190   :  { %v853_v0 = vadd.f32 %v839_v11, %v797_v5  ;;  %v857_v23 = vadd.f32 %v839_v11, %v801_v63 }
 0x192   :  { %861 = vst [vmem:[#allocation7 + $0x8] sm:$0xf] %v853_v0  ;;  %865 = vst [vmem:[#allocation7 + $0x18] sm:$0xf] %v857_v23 }
 0x193   :  { %1000 = shalt.err (!%p997_p6)
}
 0x194   :  { %s1001_s12 = scalar_lea.hbm %s1319_s2, 512 }
 0x195   :  { %p1002_p7 = scmp.ne.s32.totalorder %s1319_s2, %s1001_s12  ;;  %p1005_p8 = scmp.lt.u32.totalorder %s1001_s12, %s1319_s2 }
 0x197   :  { %p1007_p9 = pnand %p1005_p8, %p1002_p7 }
 0x199   :  { %1010 = shalt.err (!%p1007_p9)
}
 0x19a   :  { %878 = dma.vmem_to_hbm [thread:$0]  %s873_s8, 512, %s1319_s2, [#allocation4], %s1018_s19, %s1018_s19, %s1019_s20  }
 0x19b   :  { %1015 = dma.done.wait [#allocation4], 512  }
 0x19c   :  { %1016 = vsyncadd [#allocation4], 4294966784 }
 0x19d   :  { %882 = vsyncpa [#allocation3], 1 }
 0x19e   :  { %883 = vsyncpa [#allocation6], 1 }
 0x19f   :  { %884 = vsyncpa [#allocation4], 1 }

</bundles_post_ra>
